<compile_context>
chip_gen: v6e
topology: v6e:2x2x1
jax: 0.10.0
libtpu: 0.0.40
codegen_flags: <defaults>
</compile_context>

<pallas_src>
import math
import jax
import jax.numpy as jnp
from jax.experimental import pallas as pl
from jax.experimental.pallas import tpu as pltpu


def _mlp_kernel(x_ref,
                w1_ref, b1_ref,
                w2_ref, b2_ref,
                w3_ref, b3_ref,
                w4_ref, b4_ref,
                o_ref):
    # x tile and weights are bf16; accumulate on the MXU in f32, do the
    # bias-add / ReLU on the VPU in f32, re-narrow to bf16 for the next matmul.
    x = x_ref[...]                                                   # (TB, in) bf16

    h = jnp.dot(x, w1_ref[...], preferred_element_type=jnp.float32) + b1_ref[...]
    h = jnp.maximum(h, 0.0).astype(jnp.bfloat16)                     # act1 = ReLU

    h = jnp.dot(h, w2_ref[...], preferred_element_type=jnp.float32) + b2_ref[...]
    h = jnp.maximum(h, 0.0).astype(jnp.bfloat16)                     # act2 = ReLU

    h = jnp.dot(h, w3_ref[...], preferred_element_type=jnp.float32) + b3_ref[...]
    h = jnp.maximum(h, 0.0).astype(jnp.bfloat16)                     # act3 = ReLU

    out = jnp.dot(h, w4_ref[...], preferred_element_type=jnp.float32) + b4_ref[...]
    o_ref[...] = out.astype(o_ref.dtype)                             # (TB, 2) f32


def churn_prediction_nn_forward(x, params, *, tile_b=8192):
    """Fused, batch-tiled forward pass.

    x: (B, input_size) float array. params: dict of W (in,out) / b (1,out).
    Returns (B, 2) float32 logits.
    """
    batch, in_features = x.shape
    out_features = params["w4"].shape[1]                             # = 2

    # Batch tile: multiple of 8 (sublane), clamped to the (padded) batch size.
    tb = min(int(tile_b), ((batch + 7) // 8) * 8)
    tb = max(8, (tb // 8) * 8)
    padded_b = pl.cdiv(batch, tb) * tb
    if padded_b != batch:
        x = jnp.pad(x, ((0, padded_b - batch), (0, 0)))

    # bf16 streaming operands (halve HBM read bytes); biases stay f32.
    x_bf = x.astype(jnp.bfloat16)
    w1 = params["w1"].astype(jnp.bfloat16)
    w2 = params["w2"].astype(jnp.bfloat16)
    w3 = params["w3"].astype(jnp.bfloat16)
    w4 = params["w4"].astype(jnp.bfloat16)
    b1 = params["b1"].astype(jnp.float32)
    b2 = params["b2"].astype(jnp.float32)
    b3 = params["b3"].astype(jnp.float32)
    b4 = params["b4"].astype(jnp.float32)

    grid = (padded_b // tb,)

    # Constant index_map -> param buffers DMA'd once, resident across steps.
    def resident(shape):
        return pl.BlockSpec(shape, lambda i: (0, 0))

    in_specs = [
        pl.BlockSpec((tb, in_features), lambda i: (i, 0)),           # x: batch-tiled
        resident(w1.shape), resident(b1.shape),
        resident(w2.shape), resident(b2.shape),
        resident(w3.shape), resident(b3.shape),
        resident(w4.shape), resident(b4.shape),
    ]
    out_specs = pl.BlockSpec((tb, out_features), lambda i: (i, 0))

    out = pl.pallas_call(
        _mlp_kernel,
        out_shape=jax.ShapeDtypeStruct((padded_b, out_features), jnp.float32),
        grid=grid,
        in_specs=in_specs,
        out_specs=out_specs,
        compiler_params=pltpu.CompilerParams(
            dimension_semantics=("parallel",),
        ),
    )(x_bf, w1, b1, w2, b2, w3, b3, w4, b4)

    return out[:batch]


def _kaiming_uniform(key, fan_in, fan_out):
    # Matches torch.nn.init.kaiming_uniform_(w, nonlinearity='relu') on a
    # weight of shape (fan_out, fan_in): bound = sqrt(6 / fan_in).
    bound = math.sqrt(6.0 / fan_in)
    # Stored as (fan_in, fan_out) so the kernel computes x @ W (+ b), which is
    # identical math to PyTorch's x @ W_pt.T + b.
    return jax.random.uniform(key, (fan_in, fan_out), jnp.float32, -bound, bound)


def init_params(key, input_size, hs1, hs2, hs3):
    # Biases: zeros, matching the module's initialize_weights().
    k1, k2, k3, k4 = jax.random.split(key, 4)
    return {
        "w1": _kaiming_uniform(k1, input_size, hs1),
        "b1": jnp.zeros((1, hs1), jnp.float32),
        "w2": _kaiming_uniform(k2, hs1, hs2),
        "b2": jnp.zeros((1, hs2), jnp.float32),
        "w3": _kaiming_uniform(k3, hs2, hs3),
        "b3": jnp.zeros((1, hs3), jnp.float32),
        "w4": _kaiming_uniform(k4, hs3, 2),
        "b4": jnp.zeros((1, 2), jnp.float32),
    }


if __name__ == "__main__":
    # Tabular churn-prediction style shapes. Batch is deliberately NOT a
    # multiple of the tile to exercise the padding / multi-step grid path.
    batch, input_size = 1000, 16
    hs1, hs2, hs3 = 32, 32, 16
    tile_b = 256                                   # -> grid of 4 steps here

    key = jax.random.PRNGKey(0)
    kx, kp = jax.random.split(key)
    x = jax.random.normal(kx, (batch, input_size), jnp.float32)
    params = init_params(kp, input_size, hs1, hs2, hs3)

    out = churn_prediction_nn_forward(x, params, tile_b=tile_b)
    out = jax.block_until_ready(out)

    # Plain-JAX reference performing the same bf16-matmul / f32-accumulate math.
    def ref(x, p):
        def layer(h, w, b, relu):
            y = jnp.dot(h.astype(jnp.bfloat16), w.astype(jnp.bfloat16),
                        preferred_element_type=jnp.float32) + b
            return jnp.maximum(y, 0.0).astype(jnp.bfloat16) if relu else y
        h = layer(x, p["w1"], p["b1"], True)
        h = layer(h, p["w2"], p["b2"], True)
        h = layer(h, p["w3"], p["b3"], True)
        return layer(h, p["w4"], p["b4"], False)

    expected = ref(x, params)
    assert out.shape == (batch, 2), out.shape
    assert jnp.allclose(out, expected, atol=1e-3, rtol=1e-3), "mismatch vs reference"

    print("KERNEL_OK")
</pallas_src>

<mosaic_0001>
module attributes {stable_mosaic.version = 11 : i64} {
  func.func @_mlp_kernel(%arg0: i32, %arg1: memref<256x16xbf16, #tpu.memory_space<vmem>>, %arg2: memref<16x32xbf16, #tpu.memory_space<vmem>>, %arg3: memref<1x32xf32, #tpu.memory_space<vmem>>, %arg4: memref<32x32xbf16, #tpu.memory_space<vmem>>, %arg5: memref<1x32xf32, #tpu.memory_space<vmem>>, %arg6: memref<32x16xbf16, #tpu.memory_space<vmem>>, %arg7: memref<1x16xf32, #tpu.memory_space<vmem>>, %arg8: memref<16x2xbf16, #tpu.memory_space<vmem>>, %arg9: memref<1x2xf32, #tpu.memory_space<vmem>>, %arg10: memref<256x2xf32, #tpu.memory_space<vmem>>) attributes {dimension_semantics = [#tpu.dimension_semantics<parallel>], iteration_bounds = array<i64: 4>, scalar_prefetch = 0 : i64, scratch_operands = 0 : i64, tpu.core_type = #tpu.core_type<tc>, window_params = [{transform_indices = @transform_0, window_bounds = array<i64: 256, 16>}, {pipeline_mode = #tpu.pipeline_mode<synchronous>, transform_indices = @transform_1, window_bounds = array<i64: 16, 32>}, {pipeline_mode = #tpu.pipeline_mode<synchronous>, transform_indices = @transform_2, window_bounds = array<i64: 1, 32>}, {pipeline_mode = #tpu.pipeline_mode<synchronous>, transform_indices = @transform_3, window_bounds = array<i64: 32, 32>}, {pipeline_mode = #tpu.pipeline_mode<synchronous>, transform_indices = @transform_4, window_bounds = array<i64: 1, 32>}, {pipeline_mode = #tpu.pipeline_mode<synchronous>, transform_indices = @transform_5, window_bounds = array<i64: 32, 16>}, {pipeline_mode = #tpu.pipeline_mode<synchronous>, transform_indices = @transform_6, window_bounds = array<i64: 1, 16>}, {pipeline_mode = #tpu.pipeline_mode<synchronous>, transform_indices = @transform_7, window_bounds = array<i64: 16, 2>}, {pipeline_mode = #tpu.pipeline_mode<synchronous>, transform_indices = @transform_8, window_bounds = array<i64: 1, 2>}, {transform_indices = @transform_9, window_bounds = array<i64: 256, 2>}]} {
    %c0 = arith.constant 0 : index
    %c0_0 = arith.constant 0 : index
    %0 = vector.load %arg1[%c0, %c0_0] : memref<256x16xbf16, #tpu.memory_space<vmem>>, vector<256x16xbf16>
    %c0_1 = arith.constant 0 : index
    %c0_2 = arith.constant 0 : index
    %1 = vector.load %arg2[%c0_1, %c0_2] : memref<16x32xbf16, #tpu.memory_space<vmem>>, vector<16x32xbf16>
    %cst = arith.constant dense<0.000000e+00> : vector<256x32xf32>
    %2 = tpu.matmul %0, %1, %cst {dimension_numbers = #tpu.dot_dimension_numbers<[1], [0], [0], [1], [0, 0, 1, 1], [], []>} : vector<256x16xbf16>, vector<16x32xbf16>, vector<256x32xf32> -> vector<256x32xf32>
    %c0_3 = arith.constant 0 : index
    %c0_4 = arith.constant 0 : index
    %3 = vector.load %arg3[%c0_3, %c0_4] : memref<1x32xf32, #tpu.memory_space<vmem>>, vector<1x32xf32>
    %4 = vector.broadcast %3 : vector<1x32xf32> to vector<256x32xf32>
    %5 = arith.addf %2, %4 : vector<256x32xf32>
    %cst_5 = arith.constant 0.000000e+00 : f32
    %6 = vector.broadcast %cst_5 : f32 to vector<256x32xf32>
    %7 = arith.maximumf %5, %6 : vector<256x32xf32>
    %8 = arith.truncf %7 : vector<256x32xf32> to vector<256x32xbf16>
    %c0_6 = arith.constant 0 : index
    %c0_7 = arith.constant 0 : index
    %9 = vector.load %arg4[%c0_6, %c0_7] : memref<32x32xbf16, #tpu.memory_space<vmem>>, vector<32x32xbf16>
    %cst_8 = arith.constant dense<0.000000e+00> : vector<256x32xf32>
    %10 = tpu.matmul %8, %9, %cst_8 {dimension_numbers = #tpu.dot_dimension_numbers<[1], [0], [0], [1], [0, 0, 1, 1], [], []>} : vector<256x32xbf16>, vector<32x32xbf16>, vector<256x32xf32> -> vector<256x32xf32>
    %c0_9 = arith.constant 0 : index
    %c0_10 = arith.constant 0 : index
    %11 = vector.load %arg5[%c0_9, %c0_10] : memref<1x32xf32, #tpu.memory_space<vmem>>, vector<1x32xf32>
    %12 = vector.broadcast %11 : vector<1x32xf32> to vector<256x32xf32>
    %13 = arith.addf %10, %12 : vector<256x32xf32>
    %cst_11 = arith.constant 0.000000e+00 : f32
    %14 = vector.broadcast %cst_11 : f32 to vector<256x32xf32>
    %15 = arith.maximumf %13, %14 : vector<256x32xf32>
    %16 = arith.truncf %15 : vector<256x32xf32> to vector<256x32xbf16>
    %c0_12 = arith.constant 0 : index
    %c0_13 = arith.constant 0 : index
    %17 = vector.load %arg6[%c0_12, %c0_13] : memref<32x16xbf16, #tpu.memory_space<vmem>>, vector<32x16xbf16>
    %cst_14 = arith.constant dense<0.000000e+00> : vector<256x16xf32>
    %18 = tpu.matmul %16, %17, %cst_14 {dimension_numbers = #tpu.dot_dimension_numbers<[1], [0], [0], [1], [0, 0, 1, 1], [], []>} : vector<256x32xbf16>, vector<32x16xbf16>, vector<256x16xf32> -> vector<256x16xf32>
    %c0_15 = arith.constant 0 : index
    %c0_16 = arith.constant 0 : index
    %19 = vector.load %arg7[%c0_15, %c0_16] : memref<1x16xf32, #tpu.memory_space<vmem>>, vector<1x16xf32>
    %20 = vector.broadcast %19 : vector<1x16xf32> to vector<256x16xf32>
    %21 = arith.addf %18, %20 : vector<256x16xf32>
    %cst_17 = arith.constant 0.000000e+00 : f32
    %22 = vector.broadcast %cst_17 : f32 to vector<256x16xf32>
    %23 = arith.maximumf %21, %22 : vector<256x16xf32>
    %24 = arith.truncf %23 : vector<256x16xf32> to vector<256x16xbf16>
    %c0_18 = arith.constant 0 : index
    %c0_19 = arith.constant 0 : index
    %25 = vector.load %arg8[%c0_18, %c0_19] : memref<16x2xbf16, #tpu.memory_space<vmem>>, vector<16x2xbf16>
    %cst_20 = arith.constant dense<0.000000e+00> : vector<256x2xf32>
    %26 = tpu.matmul %24, %25, %cst_20 {dimension_numbers = #tpu.dot_dimension_numbers<[1], [0], [0], [1], [0, 0, 1, 1], [], []>} : vector<256x16xbf16>, vector<16x2xbf16>, vector<256x2xf32> -> vector<256x2xf32>
    %c0_21 = arith.constant 0 : index
    %c0_22 = arith.constant 0 : index
    %27 = vector.load %arg9[%c0_21, %c0_22] : memref<1x2xf32, #tpu.memory_space<vmem>>, vector<1x2xf32>
    %28 = vector.broadcast %27 : vector<1x2xf32> to vector<256x2xf32>
    %29 = arith.addf %26, %28 : vector<256x2xf32>
    %c0_23 = arith.constant 0 : index
    %c0_24 = arith.constant 0 : index
    %30 = vector.load %arg10[%c0_23, %c0_24] : memref<256x2xf32, #tpu.memory_space<vmem>>, vector<256x2xf32>
    tpu.vector_store %arg10[%c0_23, %c0_24], %29 {strides = array<i32>} : memref<256x2xf32, #tpu.memory_space<vmem>>, vector<256x2xf32>,
    return
  }
  func.func @transform_0(%arg0: i32) -> (i32, i32) {
    %c0_i32 = arith.constant 0 : i32
    %c0_i32_0 = arith.constant 0 : i32
    return %arg0, %c0_i32 : i32, i32
  }
  func.func @transform_1(%arg0: i32) -> (i32, i32) {
    %c0_i32 = arith.constant 0 : i32
    %c0_i32_0 = arith.constant 0 : i32
    %c0_i32_1 = arith.constant 0 : i32
    return %c0_i32, %c0_i32_0 : i32, i32
  }
  func.func @transform_2(%arg0: i32) -> (i32, i32) {
    %c0_i32 = arith.constant 0 : i32
    %c0_i32_0 = arith.constant 0 : i32
    %c0_i32_1 = arith.constant 0 : i32
    return %c0_i32, %c0_i32_0 : i32, i32
  }
  func.func @transform_3(%arg0: i32) -> (i32, i32) {
    %c0_i32 = arith.constant 0 : i32
    %c0_i32_0 = arith.constant 0 : i32
    %c0_i32_1 = arith.constant 0 : i32
    return %c0_i32, %c0_i32_0 : i32, i32
  }
  func.func @transform_4(%arg0: i32) -> (i32, i32) {
    %c0_i32 = arith.constant 0 : i32
    %c0_i32_0 = arith.constant 0 : i32
    %c0_i32_1 = arith.constant 0 : i32
    return %c0_i32, %c0_i32_0 : i32, i32
  }
  func.func @transform_5(%arg0: i32) -> (i32, i32) {
    %c0_i32 = arith.constant 0 : i32
    %c0_i32_0 = arith.constant 0 : i32
    %c0_i32_1 = arith.constant 0 : i32
    return %c0_i32, %c0_i32_0 : i32, i32
  }
  func.func @transform_6(%arg0: i32) -> (i32, i32) {
    %c0_i32 = arith.constant 0 : i32
    %c0_i32_0 = arith.constant 0 : i32
    %c0_i32_1 = arith.constant 0 : i32
    return %c0_i32, %c0_i32_0 : i32, i32
  }
  func.func @transform_7(%arg0: i32) -> (i32, i32) {
    %c0_i32 = arith.constant 0 : i32
    %c0_i32_0 = arith.constant 0 : i32
    %c0_i32_1 = arith.constant 0 : i32
    return %c0_i32, %c0_i32_0 : i32, i32
  }
  func.func @transform_8(%arg0: i32) -> (i32, i32) {
    %c0_i32 = arith.constant 0 : i32
    %c0_i32_0 = arith.constant 0 : i32
    %c0_i32_1 = arith.constant 0 : i32
    return %c0_i32, %c0_i32_0 : i32, i32
  }
  func.func @transform_9(%arg0: i32) -> (i32, i32) {
    %c0_i32 = arith.constant 0 : i32
    %c0_i32_0 = arith.constant 0 : i32
    return %arg0, %c0_i32 : i32, i32
  }
}

</mosaic_0001>

<bundles_post_ra>
// kernel: tpu_custom_call.1
= control target key start
LH: loop header
LB: loop body
LE: loop exit
PB: predicated region body
PF: predicated region fallthrough
CT: control target
= control target key end

     0   :  { %s1995_s30 = smov 0   ;;  %s2330_s0 = inlined_call_operand.vmem [shape: bf16[1024,16], index: 0, kind: input, shape index: {}]   ;;  %s2331_s1 = inlined_call_operand.vmem [shape: bf16[16,32], index: 1, kind: input, shape index: {}]   ;;  %s2332_s2 = inlined_call_operand.vmem [shape: f32[1,32], index: 2, kind: input, shape index: {}]   ;;  %s2333_s3 = inlined_call_operand.vmem [shape: bf16[32,32], index: 3, kind: input, shape index: {}]   ;;  %s2334_s4 = inlined_call_operand.vmem [shape: f32[1,32], index: 4, kind: input, shape index: {}]   ;;  %s2335_s5 = inlined_call_operand.vmem [shape: bf16[32,16], index: 5, kind: input, shape index: {}]   ;;  %s2336_s6 = inlined_call_operand.vmem [shape: f32[1,16], index: 6, kind: input, shape index: {}]   ;;  %s2337_s7 = inlined_call_operand.vmem [shape: bf16[16,2], index: 7, kind: input, shape index: {}]   ;;  %s2338_s8 = inlined_call_operand.vmem [shape: f32[1,2], index: 8, kind: input, shape index: {}]   ;;  %s2339_s9 = inlined_call_operand.vmem [shape: f32[1024,2], index: 9, kind: output, shape index: {}]  }
   0x1 LB: > { %s1596_s10 = sadd.s32 4294967295, %s1943_s30   ;;  %p1600_p0 = scmp.ge.s32.totalorder %s1943_s30, 1  ;;  %s1943_s30 = sphi %s1995_s30, %s19_s30  }
   0x2   : > { %p288_p1 = scmp.lt.s32.totalorder %s1943_s30, 5 }
   0x4   : > { %p289_p2 = pnand %p1600_p0, %p288_p1 }
   0x5   : > { %s1601_s13 = sshll.u32 (!%p289_p2), %s1596_s10, 5 }
   0x6   : > { %292 = sbr.rel (%p289_p2) target bundleno = 892 (0x37c), region = 56  ;;  %p325_p3 = scmp.lt.s32.totalorder (!%p289_p2), %s1601_s13, 127 }
   0xb   : > { %v1915_v0 = vld [vmem:[%s2331_s1] sm:$0xff]   ;;  %s2341_s13 = smov (!%p325_p3, %s1601_s13), 127  ;;  %vm464_vm0 = vcmask 130048   ;;  %v1932_v17 = vld [vmem:[%s2333_s3 + $0x8] sm:$0xff]   ;;  %vm745_vm1 = vcmask 261120   ;;  %vm1507_vm2 = vcmask 15360  }
   0xc   : > { %1767 = vmatprep.subr.bf16.mxu0 %v1915_v0  ;;  %s1602_s14 = sshll.u32 %s2341_s13, 2  ;;  %1801 = vmatprep.subr.bf16.mxu1 %v1932_v17  ;;  %v1933_v18 = vld [vmem:[%s2333_s3] sm:$0xff]   ;;  %v1934_v19 = vld [vmem:[%s2335_s5 + $0x8] sm:$0xff]   ;;  %s1604_s15 = sshll.u32 %s2341_s13, 3 }
   0xd   : > { %1768 = vmatpush3.bf16.msra.mxu0 %v1915_v0  ;;  %s2012_s17 = scalar_lea.vmem %s2330_s0, %s1602_s14  ;;  %1802 = vmatpush3.bf16.msra.mxu1 %v1932_v17  ;;  %v1935_v20 = vld [vmem:[%s2335_s5] sm:$0xff]   ;;  %s2229_s20 = scalar_lea.vmem %s2339_s9, %s1604_s15 }
   0xe   : > { %v1916_v1 = vld [vmem:[%s2012_s17] sm:$0xff]   ;;  %v1917_v2 = vld [vmem:[%s2012_s17 + $0x8] sm:$0xff]   ;;  %v1918_v3 = vld [vmem:[%s2012_s17 + $0x10] sm:$0xff]   ;;  %1803 = vmatprep.subr.bf16.mxu1 %v1933_v18  ;;  %1837 = vmatprep.subr.bf16.mxu0 %v1934_v19 }
   0xf   : > { %1769 = vmatprep.mubr.msk.bf16.mxu0 %vm464_vm0, %v1916_v1  ;;  %v1919_v4 = vld [vmem:[%s2012_s17 + $0x18] sm:$0xff]   ;;  %v1920_v5 = vld [vmem:[%s2012_s17 + $0x20] sm:$0xff]   ;;  %v1921_v6 = vld [vmem:[%s2012_s17 + $0x28] sm:$0xff]  }
  0x10   : > { %1770 = vmatmul.mubr.msk.bf16.vlgmr.msra.gmra.mxu0 %vm464_vm0, %v1917_v2  ;;  %v1922_v7 = vld [vmem:[%s2012_s17 + $0x30] sm:$0xff]   ;;  %v1923_v8 = vld [vmem:[%s2012_s17 + $0x38] sm:$0xff]   ;;  %v1924_v9 = vld [vmem:[%s2012_s17 + $0x40] sm:$0xff]  }
  0x11   : > { %1773 = vmatprep.mubr.msk.bf16.mxu0 %vm464_vm0, %v1918_v3  ;;  %v1925_v10 = vld [vmem:[%s2012_s17 + $0x48] sm:$0xff]   ;;  %v1926_v11 = vld [vmem:[%s2012_s17 + $0x50] sm:$0xff]   ;;  %v1927_v12 = vld [vmem:[%s2012_s17 + $0x58] sm:$0xff]   ;;  %1804 = vmatpush3.bf16.msra.mxu1 %v1933_v18 }
  0x12   : > { %v1928_v13 = vld [vmem:[%s2012_s17 + $0x60] sm:$0xff]   ;;  %v1929_v14 = vld [vmem:[%s2012_s17 + $0x68] sm:$0xff]   ;;  %v1930_v15 = vld [vmem:[%s2012_s17 + $0x70] sm:$0xff]   ;;  %1838 = vmatpush3.bf16.msra.mxu0 %v1934_v19 }
  0x13   : > { %v1931_v16 = vld [vmem:[%s2012_s17 + $0x78] sm:$0xff]   ;;  %1839 = vmatprep.subr.bf16.mxu0 %v1935_v20  ;;  %v2061_v23 = vld [vmem:[%s2332_s2] ss:$0 sm:$0xff] }
  0x16   : > { %1840 = vmatpush3.bf16.msra.mxu0 %v1935_v20 }
  0x18   : > { %1774 = vmatmul.mubr.msk.bf16.gmra.mxu0 %vm464_vm0, %v1919_v4 }
  0x19   : > { %1777 = vmatprep.mubr.msk.bf16.mxu0 %vm464_vm0, %v1920_v5 }
  0x20   : > { %1778 = vmatmul.mubr.msk.bf16.gmra.mxu0 %vm464_vm0, %v1921_v6 }
  0x21   : > { %1781 = vmatprep.mubr.msk.bf16.mxu0 %vm464_vm0, %v1922_v7 }
  0x28   : > { %1782 = vmatmul.mubr.msk.bf16.gmra.mxu0 %vm464_vm0, %v1923_v8 }
  0x29   : > { %1785 = vmatprep.mubr.msk.bf16.mxu0 %vm464_vm0, %v1924_v9 }
  0x30   : > { %1786 = vmatmul.mubr.msk.bf16.gmra.mxu0 %vm464_vm0, %v1925_v10 }
  0x31   : > { %1789 = vmatprep.mubr.msk.bf16.mxu0 %vm464_vm0, %v1926_v11 }
  0x38   : > { %1790 = vmatmul.mubr.msk.bf16.gmra.mxu0 %vm464_vm0, %v1927_v12 }
  0x39   : > { %1793 = vmatprep.mubr.msk.bf16.mxu0 %vm464_vm0, %v1928_v13 }
  0x40   : > { %1794 = vmatmul.mubr.msk.bf16.gmra.mxu0 %vm464_vm0, %v1929_v14 }
  0x41   : > { %1797 = vmatprep.mubr.msk.bf16.mxu0 %vm464_vm0, %v1930_v15 }
  0x48   : > { %1798 = vmatmul.mubr.msk.bf16.gmra.mxu0 %vm464_vm0, %v1931_v16 }
  0xd0   : > { %v1771_v21 = vpop.f32.mrf.mxu0 }
  0xd1   : > { %v556_v27 = vadd.f32 %v1771_v21, %v2061_v23 }
  0xd2   : > { %v547_v22 = vpop.f32.mrf.mxu0 }
  0xd3   : > { %v548_v25 = vadd.f32 %v2061_v23, %v547_v22  ;;  %v676_v34 = vmax.f32 %v556_v27, 0.0 }
  0xd4   : > { %v1772_v24 = vpop.f32.mrf.mxu0 }
  0xd5   : > { %v559_v26 = vadd.f32 %v1772_v24, %v2061_v23  ;;  %v674_v32 = vmax.f32 %v548_v25, 0.0 }
  0xd6   : > { %v550_v28 = vpop.f32.mrf.mxu0 }
  0xd7   : > { %v551_v29 = vadd.f32 %v2061_v23, %v550_v28  ;;  %v677_v30 = vmax.f32 %v559_v26, 0.0 }
  0xd8   : > { %v1775_v31 = vpop.f32.mrf.mxu0 }
  0xd9   : > { %v675_v33 = vmax.f32 %v551_v29, 0.0  ;;  %v707_v37 = vpack.c.bf16 %v677_v30, %v676_v34  ;;  %v572_v41 = vadd.f32 %v1775_v31, %v2061_v23 }
  0xda   : > { %v563_v35 = vpop.f32.mrf.mxu0 }
  0xdb   : > { %v706_v36 = vpack.c.bf16 %v675_v33, %v674_v32  ;;  %v564_v39 = vadd.f32 %v2061_v23, %v563_v35  ;;  %v680_v48 = vmax.f32 %v572_v41, 0.0 }
  0xdc   : > { %v1776_v38 = vpop.f32.mrf.mxu0 }
  0xdd   : > { %v575_v40 = vadd.f32 %v1776_v38, %v2061_v23  ;;  %1805 = vmatprep.mubr.msk.bf16.mxu1 %vm745_vm1, %v706_v36  ;;  %v678_v46 = vmax.f32 %v564_v39, 0.0 }
  0xde   : > { %v566_v42 = vpop.f32.mrf.mxu0  ;;  %1806 = vmatmul.mubr.msk.bf16.vlgmr.msra.gmra.mxu1 %vm745_vm1, %v707_v37 }
  0xdf   : > { %v567_v43 = vadd.f32 %v2061_v23, %v566_v42  ;;  %v681_v44 = vmax.f32 %v575_v40, 0.0 }
  0xe0   : > { %v1779_v45 = vpop.f32.mrf.mxu0 }
  0xe1   : > { %v679_v47 = vmax.f32 %v567_v43, 0.0  ;;  %v709_v51 = vpack.c.bf16 %v681_v44, %v680_v48  ;;  %v588_v55 = vadd.f32 %v1779_v45, %v2061_v23 }
  0xe2   : > { %v579_v49 = vpop.f32.mrf.mxu0 }
  0xe3   : > { %v708_v50 = vpack.c.bf16 %v679_v47, %v678_v46  ;;  %v580_v53 = vadd.f32 %v2061_v23, %v579_v49  ;;  %v684_v62 = vmax.f32 %v588_v55, 0.0 }
  0xe4   : > { %v1780_v52 = vpop.f32.mrf.mxu0 }
  0xe5   : > { %v591_v54 = vadd.f32 %v1780_v52, %v2061_v23  ;;  %1809 = vmatprep.mubr.msk.bf16.mxu1 %vm745_vm1, %v708_v50  ;;  %v682_v60 = vmax.f32 %v580_v53, 0.0 }
  0xe6   : > { %v582_v56 = vpop.f32.mrf.mxu0  ;;  %1810 = vmatmul.mubr.msk.bf16.gmra.mxu1 %vm745_vm1, %v709_v51 }
  0xe7   : > { %v583_v57 = vadd.f32 %v2061_v23, %v582_v56  ;;  %v685_v58 = vmax.f32 %v591_v54, 0.0 }
  0xe8   : > { %v1783_v59 = vpop.f32.mrf.mxu0 }
  0xe9   : > { %v683_v61 = vmax.f32 %v583_v57, 0.0  ;;  %v711_v1 = vpack.c.bf16 %v685_v58, %v684_v62  ;;  %v604_v5 = vadd.f32 %v1783_v59, %v2061_v23 }
  0xea   : > { %v595_v63 = vpop.f32.mrf.mxu0 }
  0xeb   : > { %v710_v0 = vpack.c.bf16 %v683_v61, %v682_v60  ;;  %v596_v3 = vadd.f32 %v2061_v23, %v595_v63  ;;  %v688_v12 = vmax.f32 %v604_v5, 0.0 }
  0xec   : > { %v1784_v2 = vpop.f32.mrf.mxu0 }
  0xed   : > { %v607_v4 = vadd.f32 %v1784_v2, %v2061_v23  ;;  %1813 = vmatprep.mubr.msk.bf16.mxu1 %vm745_vm1, %v710_v0  ;;  %v686_v10 = vmax.f32 %v596_v3, 0.0 }
  0xee   : > { %v598_v6 = vpop.f32.mrf.mxu0  ;;  %1814 = vmatmul.mubr.msk.bf16.gmra.mxu1 %vm745_vm1, %v711_v1 }
  0xef   : > { %v599_v7 = vadd.f32 %v2061_v23, %v598_v6  ;;  %v689_v8 = vmax.f32 %v607_v4, 0.0 }
  0xf0   : > { %v1787_v9 = vpop.f32.mrf.mxu0 }
  0xf1   : > { %v687_v11 = vmax.f32 %v599_v7, 0.0  ;;  %v713_v15 = vpack.c.bf16 %v689_v8, %v688_v12  ;;  %v620_v19 = vadd.f32 %v1787_v9, %v2061_v23  ;;  %v1936_v7 = vld [vmem:[%s2337_s7] sm:$0xff]  }
  0xf2   : > { %v611_v13 = vpop.f32.mrf.mxu0  ;;  %1873 = vmatprep.subr.bf16.mxu1 %v1936_v7 }
  0xf3   : > { %v712_v14 = vpack.c.bf16 %v687_v11, %v686_v10  ;;  %v612_v17 = vadd.f32 %v2061_v23, %v611_v13  ;;  %v692_v27 = vmax.f32 %v620_v19, 0.0  ;;  %1874 = vmatpush3.bf16.msra.mxu1 %v1936_v7 }
  0xf4   : > { %v1788_v16 = vpop.f32.mrf.mxu0 }
  0xf5   : > { %v623_v18 = vadd.f32 %v1788_v16, %v2061_v23  ;;  %1817 = vmatprep.mubr.msk.bf16.mxu1 %vm745_vm1, %v712_v14  ;;  %v690_v25 = vmax.f32 %v612_v17, 0.0 }
  0xf6   : > { %v614_v20 = vpop.f32.mrf.mxu0  ;;  %1818 = vmatmul.mubr.msk.bf16.gmra.mxu1 %vm745_vm1, %v713_v15 }
  0xf7   : > { %v615_v21 = vadd.f32 %v2061_v23, %v614_v20  ;;  %v693_v22 = vmax.f32 %v623_v18, 0.0 }
  0xf8   : > { %v1791_v24 = vpop.f32.mrf.mxu0 }
  0xf9   : > { %v691_v26 = vmax.f32 %v615_v21, 0.0  ;;  %v715_v30 = vpack.c.bf16 %v693_v22, %v692_v27  ;;  %v636_v34 = vadd.f32 %v1791_v24, %v2061_v23 }
  0xfa   : > { %v627_v28 = vpop.f32.mrf.mxu0 }
  0xfb   : > { %v714_v29 = vpack.c.bf16 %v691_v26, %v690_v25  ;;  %v628_v32 = vadd.f32 %v2061_v23, %v627_v28  ;;  %v696_v41 = vmax.f32 %v636_v34, 0.0 }
  0xfc   : > { %v1792_v31 = vpop.f32.mrf.mxu0 }
  0xfd   : > { %v639_v33 = vadd.f32 %v1792_v31, %v2061_v23  ;;  %1821 = vmatprep.mubr.msk.bf16.mxu1 %vm745_vm1, %v714_v29  ;;  %v694_v39 = vmax.f32 %v628_v32, 0.0 }
  0xfe   : > { %v630_v35 = vpop.f32.mrf.mxu0  ;;  %1822 = vmatmul.mubr.msk.bf16.gmra.mxu1 %vm745_vm1, %v715_v30 }
  0xff   : > { %v631_v36 = vadd.f32 %v2061_v23, %v630_v35  ;;  %v697_v37 = vmax.f32 %v639_v33, 0.0 }
 0x100   : > { %v1795_v38 = vpop.f32.mrf.mxu0 }
 0x101   : > { %v695_v40 = vmax.f32 %v631_v36, 0.0  ;;  %v717_v44 = vpack.c.bf16 %v697_v37, %v696_v41  ;;  %v652_v48 = vadd.f32 %v1795_v38, %v2061_v23 }
 0x102   : > { %v643_v42 = vpop.f32.mrf.mxu0 }
 0x103   : > { %v716_v43 = vpack.c.bf16 %v695_v40, %v694_v39  ;;  %v644_v46 = vadd.f32 %v2061_v23, %v643_v42  ;;  %v700_v55 = vmax.f32 %v652_v48, 0.0 }
 0x104   : > { %v1796_v45 = vpop.f32.mrf.mxu0 }
 0x105   : > { %v655_v47 = vadd.f32 %v1796_v45, %v2061_v23  ;;  %1825 = vmatprep.mubr.msk.bf16.mxu1 %vm745_vm1, %v716_v43  ;;  %v698_v53 = vmax.f32 %v644_v46, 0.0 }
 0x106   : > { %v646_v49 = vpop.f32.mrf.mxu0  ;;  %1826 = vmatmul.mubr.msk.bf16.gmra.mxu1 %vm745_vm1, %v717_v44 }
 0x107   : > { %v647_v50 = vadd.f32 %v2061_v23, %v646_v49  ;;  %v701_v51 = vmax.f32 %v655_v47, 0.0 }
 0x108   : > { %v1799_v52 = vpop.f32.mrf.mxu0 }
 0x109   : > { %v699_v54 = vmax.f32 %v647_v50, 0.0  ;;  %v719_v58 = vpack.c.bf16 %v701_v51, %v700_v55  ;;  %v668_v62 = vadd.f32 %v1799_v52, %v2061_v23 }
 0x10a   : > { %v659_v56 = vpop.f32.mrf.mxu0 }
 0x10b   : > { %v718_v57 = vpack.c.bf16 %v699_v54, %v698_v53  ;;  %v660_v60 = vadd.f32 %v2061_v23, %v659_v56  ;;  %v704_v4 = vmax.f32 %v668_v62, 0.0 }
 0x10c   : > { %v1800_v59 = vpop.f32.mrf.mxu0 }
 0x10d   : > { %v671_v61 = vadd.f32 %v1800_v59, %v2061_v23  ;;  %1829 = vmatprep.mubr.msk.bf16.mxu1 %vm745_vm1, %v718_v57  ;;  %v702_v2 = vmax.f32 %v660_v60, 0.0 }
 0x10e   : > { %v662_v63 = vpop.f32.mrf.mxu0  ;;  %1830 = vmatmul.mubr.msk.bf16.gmra.mxu1 %vm745_vm1, %v719_v58 }
 0x10f   : > { %v663_v0 = vadd.f32 %v2061_v23, %v662_v63  ;;  %v705_v1 = vmax.f32 %v671_v61, 0.0  ;;  %v2117_v23 = vld [vmem:[%s2334_s4] ss:$0 sm:$0xff] }
 0x111   : > { %v703_v3 = vmax.f32 %v663_v0, 0.0  ;;  %v721_v6 = vpack.c.bf16 %v705_v1, %v704_v4 }
 0x113   : > { %v720_v5 = vpack.c.bf16 %v703_v3, %v702_v2 }
 0x115   : > { %1833 = vmatprep.mubr.msk.bf16.mxu1 %vm745_vm1, %v720_v5 }
 0x116   : > { %1834 = vmatmul.mubr.msk.bf16.gmra.mxu1 %vm745_vm1, %v721_v6 }
 0x19e   : > { %v1807_v8 = vpop.f32.mrf.mxu1 }
 0x19f   : > { %v837_v13 = vadd.f32 %v1807_v8, %v2117_v23 }
 0x1a0   : > { %v828_v9 = vpop.f32.mrf.mxu1 }
 0x1a1   : > { %v829_v11 = vadd.f32 %v2117_v23, %v828_v9  ;;  %v957_v20 = vmax.f32 %v837_v13, 0.0 }
 0x1a2   : > { %v1808_v10 = vpop.f32.mrf.mxu1 }
 0x1a3   : > { %v840_v12 = vadd.f32 %v1808_v10, %v2117_v23  ;;  %v955_v18 = vmax.f32 %v829_v11, 0.0 }
 0x1a4   : > { %v831_v14 = vpop.f32.mrf.mxu1 }
 0x1a5   : > { %v832_v15 = vadd.f32 %v2117_v23, %v831_v14  ;;  %v958_v16 = vmax.f32 %v840_v12, 0.0 }
 0x1a6   : > { %v1811_v17 = vpop.f32.mrf.mxu1 }
 0x1a7   : > { %v956_v19 = vmax.f32 %v832_v15, 0.0  ;;  %v988_v24 = vpack.c.bf16 %v958_v16, %v957_v20  ;;  %v853_v28 = vadd.f32 %v1811_v17, %v2117_v23 }
 0x1a8   : > { %v844_v21 = vpop.f32.mrf.mxu1 }
 0x1a9   : > { %v987_v22 = vpack.c.bf16 %v956_v19, %v955_v18  ;;  %v845_v26 = vadd.f32 %v2117_v23, %v844_v21  ;;  %v961_v35 = vmax.f32 %v853_v28, 0.0 }
 0x1aa   : > { %v1812_v25 = vpop.f32.mrf.mxu1 }
 0x1ab   : > { %v856_v27 = vadd.f32 %v1812_v25, %v2117_v23  ;;  %1841 = vmatprep.mubr.msk.bf16.mxu0 %vm745_vm1, %v987_v22  ;;  %v959_v33 = vmax.f32 %v845_v26, 0.0 }
 0x1ac   : > { %v847_v29 = vpop.f32.mrf.mxu1  ;;  %1842 = vmatmul.mubr.msk.bf16.vlgmr.msra.gmra.mxu0 %vm745_vm1, %v988_v24 }
 0x1ad   : > { %v848_v30 = vadd.f32 %v2117_v23, %v847_v29  ;;  %v962_v31 = vmax.f32 %v856_v27, 0.0 }
 0x1ae   : > { %v1815_v32 = vpop.f32.mrf.mxu1 }
 0x1af   : > { %v960_v34 = vmax.f32 %v848_v30, 0.0  ;;  %v990_v38 = vpack.c.bf16 %v962_v31, %v961_v35  ;;  %v869_v42 = vadd.f32 %v1815_v32, %v2117_v23 }
 0x1b0   : > { %v860_v36 = vpop.f32.mrf.mxu1 }
 0x1b1   : > { %v989_v37 = vpack.c.bf16 %v960_v34, %v959_v33  ;;  %v861_v40 = vadd.f32 %v2117_v23, %v860_v36  ;;  %v965_v49 = vmax.f32 %v869_v42, 0.0 }
 0x1b2   : > { %v1816_v39 = vpop.f32.mrf.mxu1 }
 0x1b3   : > { %v872_v41 = vadd.f32 %v1816_v39, %v2117_v23  ;;  %1845 = vmatprep.mubr.msk.bf16.mxu0 %vm745_vm1, %v989_v37  ;;  %v963_v47 = vmax.f32 %v861_v40, 0.0 }
 0x1b4   : > { %v863_v43 = vpop.f32.mrf.mxu1  ;;  %1846 = vmatmul.mubr.msk.bf16.gmra.mxu0 %vm745_vm1, %v990_v38 }
 0x1b5   : > { %v864_v44 = vadd.f32 %v2117_v23, %v863_v43  ;;  %v966_v45 = vmax.f32 %v872_v41, 0.0 }
 0x1b6   : > { %v1819_v46 = vpop.f32.mrf.mxu1 }
 0x1b7   : > { %v964_v48 = vmax.f32 %v864_v44, 0.0  ;;  %v992_v52 = vpack.c.bf16 %v966_v45, %v965_v49  ;;  %v885_v56 = vadd.f32 %v1819_v46, %v2117_v23 }
 0x1b8   : > { %v876_v50 = vpop.f32.mrf.mxu1 }
 0x1b9   : > { %v991_v51 = vpack.c.bf16 %v964_v48, %v963_v47  ;;  %v877_v54 = vadd.f32 %v2117_v23, %v876_v50  ;;  %v969_v63 = vmax.f32 %v885_v56, 0.0 }
 0x1ba   : > { %v1820_v53 = vpop.f32.mrf.mxu1 }
 0x1bb   : > { %v888_v55 = vadd.f32 %v1820_v53, %v2117_v23  ;;  %1849 = vmatprep.mubr.msk.bf16.mxu0 %vm745_vm1, %v991_v51  ;;  %v967_v61 = vmax.f32 %v877_v54, 0.0 }
 0x1bc   : > { %v879_v57 = vpop.f32.mrf.mxu1  ;;  %1850 = vmatmul.mubr.msk.bf16.gmra.mxu0 %vm745_vm1, %v992_v52 }
 0x1bd   : > { %v880_v58 = vadd.f32 %v2117_v23, %v879_v57  ;;  %v970_v59 = vmax.f32 %v888_v55, 0.0 }
 0x1be   : > { %v1823_v60 = vpop.f32.mrf.mxu1 }
 0x1bf   : > { %v968_v62 = vmax.f32 %v880_v58, 0.0  ;;  %v994_v2 = vpack.c.bf16 %v970_v59, %v969_v63  ;;  %v901_v6 = vadd.f32 %v1823_v60, %v2117_v23  ;;  %v2170_v60 = vld [vmem:[%s2336_s6] ss:$0 sm:$0xff] }
 0x1c0   : > { %v892_v0 = vpop.f32.mrf.mxu1 }
 0x1c1   : > { %v993_v1 = vpack.c.bf16 %v968_v62, %v967_v61  ;;  %v893_v4 = vadd.f32 %v2117_v23, %v892_v0  ;;  %v973_v13 = vmax.f32 %v901_v6, 0.0 }
 0x1c2   : > { %v1824_v3 = vpop.f32.mrf.mxu1 }
 0x1c3   : > { %v904_v5 = vadd.f32 %v1824_v3, %v2117_v23  ;;  %1853 = vmatprep.mubr.msk.bf16.mxu0 %vm745_vm1, %v993_v1  ;;  %v971_v11 = vmax.f32 %v893_v4, 0.0 }
 0x1c4   : > { %v895_v7 = vpop.f32.mrf.mxu1  ;;  %1854 = vmatmul.mubr.msk.bf16.gmra.mxu0 %vm745_vm1, %v994_v2 }
 0x1c5   : > { %v896_v8 = vadd.f32 %v2117_v23, %v895_v7  ;;  %v974_v9 = vmax.f32 %v904_v5, 0.0 }
 0x1c6   : > { %v1827_v10 = vpop.f32.mrf.mxu1 }
 0x1c7   : > { %v972_v12 = vmax.f32 %v896_v8, 0.0  ;;  %v996_v16 = vpack.c.bf16 %v974_v9, %v973_v13  ;;  %v917_v20 = vadd.f32 %v1827_v10, %v2117_v23 }
 0x1c8   : > { %v908_v14 = vpop.f32.mrf.mxu1 }
 0x1c9   : > { %v995_v15 = vpack.c.bf16 %v972_v12, %v971_v11  ;;  %v909_v18 = vadd.f32 %v2117_v23, %v908_v14  ;;  %v977_v28 = vmax.f32 %v917_v20, 0.0 }
 0x1ca   : > { %v1828_v17 = vpop.f32.mrf.mxu1 }
 0x1cb   : > { %v920_v19 = vadd.f32 %v1828_v17, %v2117_v23  ;;  %1857 = vmatprep.mubr.msk.bf16.mxu0 %vm745_vm1, %v995_v15  ;;  %v975_v26 = vmax.f32 %v909_v18, 0.0 }
 0x1cc   : > { %v911_v21 = vpop.f32.mrf.mxu1  ;;  %1858 = vmatmul.mubr.msk.bf16.gmra.mxu0 %vm745_vm1, %v996_v16 }
 0x1cd   : > { %v912_v22 = vadd.f32 %v2117_v23, %v911_v21  ;;  %v978_v24 = vmax.f32 %v920_v19, 0.0 }
 0x1ce   : > { %v1831_v25 = vpop.f32.mrf.mxu1 }
 0x1cf   : > { %v976_v27 = vmax.f32 %v912_v22, 0.0  ;;  %v998_v31 = vpack.c.bf16 %v978_v24, %v977_v28  ;;  %v933_v35 = vadd.f32 %v1831_v25, %v2117_v23 }
 0x1d0   : > { %v924_v29 = vpop.f32.mrf.mxu1 }
 0x1d1   : > { %v997_v30 = vpack.c.bf16 %v976_v27, %v975_v26  ;;  %v925_v33 = vadd.f32 %v2117_v23, %v924_v29  ;;  %v981_v42 = vmax.f32 %v933_v35, 0.0 }
 0x1d2   : > { %v1832_v32 = vpop.f32.mrf.mxu1 }
 0x1d3   : > { %v936_v34 = vadd.f32 %v1832_v32, %v2117_v23  ;;  %1861 = vmatprep.mubr.msk.bf16.mxu0 %vm745_vm1, %v997_v30  ;;  %v979_v40 = vmax.f32 %v925_v33, 0.0 }
 0x1d4   : > { %v927_v36 = vpop.f32.mrf.mxu1  ;;  %1862 = vmatmul.mubr.msk.bf16.gmra.mxu0 %vm745_vm1, %v998_v31 }
 0x1d5   : > { %v928_v37 = vadd.f32 %v2117_v23, %v927_v36  ;;  %v982_v38 = vmax.f32 %v936_v34, 0.0 }
 0x1d6   : > { %v1835_v39 = vpop.f32.mrf.mxu1 }
 0x1d7   : > { %v980_v41 = vmax.f32 %v928_v37, 0.0  ;;  %v1000_v45 = vpack.c.bf16 %v982_v38, %v981_v42  ;;  %v949_v49 = vadd.f32 %v1835_v39, %v2117_v23 }
 0x1d8   : > { %v940_v43 = vpop.f32.mrf.mxu1 }
 0x1d9   : > { %v999_v44 = vpack.c.bf16 %v980_v41, %v979_v40  ;;  %v941_v47 = vadd.f32 %v2117_v23, %v940_v43  ;;  %v985_v55 = vmax.f32 %v949_v49, 0.0 }
 0x1da   : > { %v1836_v46 = vpop.f32.mrf.mxu1 }
 0x1db   : > { %v952_v48 = vadd.f32 %v1836_v46, %v2117_v23  ;;  %1865 = vmatprep.mubr.msk.bf16.mxu0 %vm745_vm1, %v999_v44  ;;  %v983_v53 = vmax.f32 %v941_v47, 0.0 }
 0x1dc   : > { %v943_v50 = vpop.f32.mrf.mxu1  ;;  %1866 = vmatmul.mubr.msk.bf16.gmra.mxu0 %vm745_vm1, %v1000_v45 }
 0x1dd   : > { %v944_v51 = vadd.f32 %v2117_v23, %v943_v50  ;;  %v986_v52 = vmax.f32 %v952_v48, 0.0 }
 0x1df   : > { %v984_v54 = vmax.f32 %v944_v51, 0.0  ;;  %v1002_v57 = vpack.c.bf16 %v986_v52, %v985_v55 }
 0x1e1   : > { %v1001_v56 = vpack.c.bf16 %v984_v54, %v983_v53 }
 0x1e3   : > { %1869 = vmatprep.mubr.msk.bf16.mxu0 %vm745_vm1, %v1001_v56 }
 0x1e4   : > { %1870 = vmatmul.mubr.msk.bf16.gmra.mxu0 %vm745_vm1, %v1002_v57 }
 0x26c   : > { %v1843_v58 = vpop.f32.mrf.mxu0 }
 0x26d   : > { %v1117_v63 = vadd.f32 %v1843_v58, %v2170_v60 }
 0x26e   : > { %v1108_v59 = vpop.f32.mrf.mxu0 }
 0x26f   : > { %v1109_v23 = vadd.f32 %v2170_v60, %v1108_v59  ;;  %v1237_v6 = vmax.f32 %v1117_v63, 0.0 }
 0x270   : > { %v1844_v61 = vpop.f32.mrf.mxu0 }
 0x271   : > { %v1120_v62 = vadd.f32 %v1844_v61, %v2170_v60  ;;  %v1235_v4 = vmax.f32 %v1109_v23, 0.0 }
 0x272   : > { %v1111_v0 = vpop.f32.mrf.mxu0 }
 0x273   : > { %v1112_v1 = vadd.f32 %v2170_v60, %v1111_v0  ;;  %v1238_v2 = vmax.f32 %v1120_v62, 0.0 }
 0x274   : > { %v1847_v3 = vpop.f32.mrf.mxu0 }
 0x275   : > { %v1236_v5 = vmax.f32 %v1112_v1, 0.0  ;;  %v1268_v9 = vpack.c.bf16 %v1238_v2, %v1237_v6  ;;  %v1133_v13 = vadd.f32 %v1847_v3, %v2170_v60 }
 0x276   : > { %v1124_v7 = vpop.f32.mrf.mxu0 }
 0x277   : > { %v1267_v8 = vpack.c.bf16 %v1236_v5, %v1235_v4  ;;  %v1125_v11 = vadd.f32 %v2170_v60, %v1124_v7  ;;  %v1241_v20 = vmax.f32 %v1133_v13, 0.0 }
 0x278   : > { %v1848_v10 = vpop.f32.mrf.mxu0 }
 0x279   : > { %v1136_v12 = vadd.f32 %v1848_v10, %v2170_v60  ;;  %1875 = vmatprep.mubr.msk.bf16.mxu1 %vm464_vm0, %v1267_v8  ;;  %v1239_v18 = vmax.f32 %v1125_v11, 0.0 }
 0x27a   : > { %v1127_v14 = vpop.f32.mrf.mxu0  ;;  %1876 = vmatmul.mubr.msk.bf16.vlgmr.msra.gmra.mxu1 %vm464_vm0, %v1268_v9 }
 0x27b   : > { %v1128_v15 = vadd.f32 %v2170_v60, %v1127_v14  ;;  %v1242_v16 = vmax.f32 %v1136_v12, 0.0 }
 0x27c   : > { %v1851_v17 = vpop.f32.mrf.mxu0 }
 0x27d   : > { %v1240_v19 = vmax.f32 %v1128_v15, 0.0  ;;  %v1270_v24 = vpack.c.bf16 %v1242_v16, %v1241_v20  ;;  %v1149_v28 = vadd.f32 %v1851_v17, %v2170_v60 }
 0x27e   : > { %v1140_v21 = vpop.f32.mrf.mxu0 }
 0x27f   : > { %v1269_v22 = vpack.c.bf16 %v1240_v19, %v1239_v18  ;;  %v1141_v26 = vadd.f32 %v2170_v60, %v1140_v21  ;;  %v1245_v35 = vmax.f32 %v1149_v28, 0.0 }
 0x280   : > { %v1852_v25 = vpop.f32.mrf.mxu0 }
 0x281   : > { %v1152_v27 = vadd.f32 %v1852_v25, %v2170_v60  ;;  %1879 = vmatprep.mubr.msk.bf16.mxu1 %vm464_vm0, %v1269_v22  ;;  %v1243_v33 = vmax.f32 %v1141_v26, 0.0 }
 0x282   : > { %v1143_v29 = vpop.f32.mrf.mxu0  ;;  %1880 = vmatmul.mubr.msk.bf16.gmra.mxu1 %vm464_vm0, %v1270_v24 }
 0x283   : > { %v1144_v30 = vadd.f32 %v2170_v60, %v1143_v29  ;;  %v1246_v31 = vmax.f32 %v1152_v27, 0.0 }
 0x284   : > { %v1855_v32 = vpop.f32.mrf.mxu0 }
 0x285   : > { %v1244_v34 = vmax.f32 %v1144_v30, 0.0  ;;  %v1272_v38 = vpack.c.bf16 %v1246_v31, %v1245_v35  ;;  %v1165_v42 = vadd.f32 %v1855_v32, %v2170_v60 }
 0x286   : > { %v1156_v36 = vpop.f32.mrf.mxu0 }
 0x287   : > { %v1271_v37 = vpack.c.bf16 %v1244_v34, %v1243_v33  ;;  %v1157_v40 = vadd.f32 %v2170_v60, %v1156_v36  ;;  %v1249_v49 = vmax.f32 %v1165_v42, 0.0 }
 0x288   : > { %v1856_v39 = vpop.f32.mrf.mxu0 }
 0x289   : > { %v1168_v41 = vadd.f32 %v1856_v39, %v2170_v60  ;;  %1883 = vmatprep.mubr.msk.bf16.mxu1 %vm464_vm0, %v1271_v37  ;;  %v1247_v47 = vmax.f32 %v1157_v40, 0.0 }
 0x28a   : > { %v1159_v43 = vpop.f32.mrf.mxu0  ;;  %1884 = vmatmul.mubr.msk.bf16.gmra.mxu1 %vm464_vm0, %v1272_v38 }
 0x28b   : > { %v1160_v44 = vadd.f32 %v2170_v60, %v1159_v43  ;;  %v1250_v45 = vmax.f32 %v1168_v41, 0.0 }
 0x28c   : > { %v1859_v46 = vpop.f32.mrf.mxu0 }
 0x28d   : > { %v1248_v48 = vmax.f32 %v1160_v44, 0.0  ;;  %v1274_v52 = vpack.c.bf16 %v1250_v45, %v1249_v49  ;;  %v1181_v56 = vadd.f32 %v1859_v46, %v2170_v60  ;;  %v2224_v44 = vld [vmem:[%s2338_s8] ss:$0 sm:$0xff] }
 0x28e   : > { %v1172_v50 = vpop.f32.mrf.mxu0 }
 0x28f   : > { %v1273_v51 = vpack.c.bf16 %v1248_v48, %v1247_v47  ;;  %v1173_v54 = vadd.f32 %v2170_v60, %v1172_v50  ;;  %v1253_v63 = vmax.f32 %v1181_v56, 0.0 }
 0x290   : > { %v1860_v53 = vpop.f32.mrf.mxu0 }
 0x291   : > { %v1184_v55 = vadd.f32 %v1860_v53, %v2170_v60  ;;  %1887 = vmatprep.mubr.msk.bf16.mxu1 %vm464_vm0, %v1273_v51  ;;  %v1251_v23 = vmax.f32 %v1173_v54, 0.0 }
 0x292   : > { %v1175_v57 = vpop.f32.mrf.mxu0  ;;  %1888 = vmatmul.mubr.msk.bf16.gmra.mxu1 %vm464_vm0, %v1274_v52 }
 0x293   : > { %v1176_v58 = vadd.f32 %v2170_v60, %v1175_v57  ;;  %v1254_v59 = vmax.f32 %v1184_v55, 0.0 }
 0x294   : > { %v1863_v61 = vpop.f32.mrf.mxu0 }
 0x295   : > { %v1252_v62 = vmax.f32 %v1176_v58, 0.0  ;;  %v1276_v2 = vpack.c.bf16 %v1254_v59, %v1253_v63  ;;  %v1197_v6 = vadd.f32 %v1863_v61, %v2170_v60 }
 0x296   : > { %v1188_v0 = vpop.f32.mrf.mxu0 }
 0x297   : > { %v1275_v1 = vpack.c.bf16 %v1252_v62, %v1251_v23  ;;  %v1189_v4 = vadd.f32 %v2170_v60, %v1188_v0  ;;  %v1257_v13 = vmax.f32 %v1197_v6, 0.0 }
 0x298   : > { %v1864_v3 = vpop.f32.mrf.mxu0 }
 0x299   : > { %v1200_v5 = vadd.f32 %v1864_v3, %v2170_v60  ;;  %1891 = vmatprep.mubr.msk.bf16.mxu1 %vm464_vm0, %v1275_v1  ;;  %v1255_v11 = vmax.f32 %v1189_v4, 0.0 }
 0x29a   : > { %v1191_v7 = vpop.f32.mrf.mxu0  ;;  %1892 = vmatmul.mubr.msk.bf16.gmra.mxu1 %vm464_vm0, %v1276_v2 }
 0x29b   : > { %v1192_v8 = vadd.f32 %v2170_v60, %v1191_v7  ;;  %v1258_v9 = vmax.f32 %v1200_v5, 0.0 }
 0x29c   : > { %v1867_v10 = vpop.f32.mrf.mxu0 }
 0x29d   : > { %v1256_v12 = vmax.f32 %v1192_v8, 0.0  ;;  %v1278_v16 = vpack.c.bf16 %v1258_v9, %v1257_v13  ;;  %v1213_v20 = vadd.f32 %v1867_v10, %v2170_v60 }
 0x29e   : > { %v1204_v14 = vpop.f32.mrf.mxu0 }
 0x29f   : > { %v1277_v15 = vpack.c.bf16 %v1256_v12, %v1255_v11  ;;  %v1205_v18 = vadd.f32 %v2170_v60, %v1204_v14  ;;  %v1261_v28 = vmax.f32 %v1213_v20, 0.0 }
 0x2a0   : > { %v1868_v17 = vpop.f32.mrf.mxu0 }
 0x2a1   : > { %v1216_v19 = vadd.f32 %v1868_v17, %v2170_v60  ;;  %1895 = vmatprep.mubr.msk.bf16.mxu1 %vm464_vm0, %v1277_v15  ;;  %v1259_v26 = vmax.f32 %v1205_v18, 0.0 }
 0x2a2   : > { %v1207_v21 = vpop.f32.mrf.mxu0  ;;  %1896 = vmatmul.mubr.msk.bf16.gmra.mxu1 %vm464_vm0, %v1278_v16 }
 0x2a3   : > { %v1208_v22 = vadd.f32 %v2170_v60, %v1207_v21  ;;  %v1262_v24 = vmax.f32 %v1216_v19, 0.0 }
 0x2a4   : > { %v1871_v25 = vpop.f32.mrf.mxu0 }
 0x2a5   : > { %v1260_v27 = vmax.f32 %v1208_v22, 0.0  ;;  %v1280_v31 = vpack.c.bf16 %v1262_v24, %v1261_v28  ;;  %v1229_v35 = vadd.f32 %v1871_v25, %v2170_v60 }
 0x2a6   : > { %v1220_v29 = vpop.f32.mrf.mxu0 }
 0x2a7   : > { %v1279_v30 = vpack.c.bf16 %v1260_v27, %v1259_v26  ;;  %v1221_v33 = vadd.f32 %v2170_v60, %v1220_v29  ;;  %v1265_v41 = vmax.f32 %v1229_v35, 0.0 }
 0x2a8   : > { %v1872_v32 = vpop.f32.mrf.mxu0 }
 0x2a9   : > { %v1232_v34 = vadd.f32 %v1872_v32, %v2170_v60  ;;  %1899 = vmatprep.mubr.msk.bf16.mxu1 %vm464_vm0, %v1279_v30  ;;  %v1263_v39 = vmax.f32 %v1221_v33, 0.0 }
 0x2aa   : > { %v1223_v36 = vpop.f32.mrf.mxu0  ;;  %1900 = vmatmul.mubr.msk.bf16.gmra.mxu1 %vm464_vm0, %v1280_v31 }
 0x2ab   : > { %v1224_v37 = vadd.f32 %v2170_v60, %v1223_v36  ;;  %v1266_v38 = vmax.f32 %v1232_v34, 0.0 }
 0x2ad   : > { %v1264_v40 = vmax.f32 %v1224_v37, 0.0  ;;  %v1282_v43 = vpack.c.bf16 %v1266_v38, %v1265_v41 }
 0x2af   : > { %v1281_v42 = vpack.c.bf16 %v1264_v40, %v1263_v39 }
 0x2b1   : > { %1903 = vmatprep.mubr.msk.bf16.mxu1 %vm464_vm0, %v1281_v42 }
 0x2b2   : > { %1904 = vmatmul.mubr.msk.bf16.gmra.mxu1 %vm464_vm0, %v1282_v43 }
 0x33a   : > { %v1877_v60 = vpop.f32.mrf.mxu1 }
 0x33b   : > { %v1389_v45 = vadd.f32 %v1877_v60, %v2224_v44 }
 0x33c   : > { %v1380_v46 = vpop.f32.mrf.mxu1 }
 0x33d   : > { %1510 = vst.msk [vmem:[%s2229_s20 + $0x10] sm:$0xff] %vm1507_vm2, %v1389_v45  ;;  %v1381_v47 = vadd.f32 %v2224_v44, %v1380_v46 }
 0x33e   : > { %v1878_v48 = vpop.f32.mrf.mxu1 }
 0x33f   : > { %1508 = vst.msk [vmem:[%s2229_s20] sm:$0xff] %vm1507_vm2, %v1381_v47  ;;  %v1392_v49 = vadd.f32 %v1878_v48, %v2224_v44 }
 0x340   : > { %v1383_v50 = vpop.f32.mrf.mxu1 }
 0x341   : > { %1511 = vst.msk [vmem:[%s2229_s20 + $0x18] sm:$0xff] %vm1507_vm2, %v1392_v49  ;;  %v1384_v51 = vadd.f32 %v2224_v44, %v1383_v50 }
 0x342   : > { %v1881_v52 = vpop.f32.mrf.mxu1 }
 0x343   : > { %1509 = vst.msk [vmem:[%s2229_s20 + $0x8] sm:$0xff] %vm1507_vm2, %v1384_v51  ;;  %v1405_v53 = vadd.f32 %v1881_v52, %v2224_v44 }
 0x344   : > { %v1396_v54 = vpop.f32.mrf.mxu1 }
 0x345   : > { %1514 = vst.msk [vmem:[%s2229_s20 + $0x30] sm:$0xff] %vm1507_vm2, %v1405_v53  ;;  %v1397_v55 = vadd.f32 %v2224_v44, %v1396_v54 }
 0x346   : > { %v1882_v56 = vpop.f32.mrf.mxu1 }
 0x347   : > { %1512 = vst.msk [vmem:[%s2229_s20 + $0x20] sm:$0xff] %vm1507_vm2, %v1397_v55  ;;  %v1408_v57 = vadd.f32 %v1882_v56, %v2224_v44 }
 0x348   : > { %v1399_v58 = vpop.f32.mrf.mxu1 }
 0x349   : > { %1515 = vst.msk [vmem:[%s2229_s20 + $0x38] sm:$0xff] %vm1507_vm2, %v1408_v57  ;;  %v1400_v59 = vadd.f32 %v2224_v44, %v1399_v58 }
 0x34a   : > { %v1885_v61 = vpop.f32.mrf.mxu1 }
 0x34b   : > { %1513 = vst.msk [vmem:[%s2229_s20 + $0x28] sm:$0xff] %vm1507_vm2, %v1400_v59  ;;  %v1421_v23 = vadd.f32 %v1885_v61, %v2224_v44 }
 0x34c   : > { %v1412_v62 = vpop.f32.mrf.mxu1 }
 0x34d   : > { %1518 = vst.msk [vmem:[%s2229_s20 + $0x50] sm:$0xff] %vm1507_vm2, %v1421_v23  ;;  %v1413_v63 = vadd.f32 %v2224_v44, %v1412_v62 }
 0x34e   : > { %v1886_v0 = vpop.f32.mrf.mxu1 }
 0x34f   : > { %1516 = vst.msk [vmem:[%s2229_s20 + $0x40] sm:$0xff] %vm1507_vm2, %v1413_v63  ;;  %v1424_v1 = vadd.f32 %v1886_v0, %v2224_v44 }
 0x350   : > { %v1415_v2 = vpop.f32.mrf.mxu1 }
 0x351   : > { %1519 = vst.msk [vmem:[%s2229_s20 + $0x58] sm:$0xff] %vm1507_vm2, %v1424_v1  ;;  %v1416_v3 = vadd.f32 %v2224_v44, %v1415_v2 }
 0x352   : > { %v1889_v4 = vpop.f32.mrf.mxu1 }
 0x353   : > { %1517 = vst.msk [vmem:[%s2229_s20 + $0x48] sm:$0xff] %vm1507_vm2, %v1416_v3  ;;  %v1437_v5 = vadd.f32 %v1889_v4, %v2224_v44 }
 0x354   : > { %v1428_v6 = vpop.f32.mrf.mxu1 }
 0x355   : > { %1522 = vst.msk [vmem:[%s2229_s20 + $0x70] sm:$0xff] %vm1507_vm2, %v1437_v5  ;;  %v1429_v7 = vadd.f32 %v2224_v44, %v1428_v6 }
 0x356   : > { %v1890_v8 = vpop.f32.mrf.mxu1 }
 0x357   : > { %1520 = vst.msk [vmem:[%s2229_s20 + $0x60] sm:$0xff] %vm1507_vm2, %v1429_v7  ;;  %v1440_v9 = vadd.f32 %v1890_v8, %v2224_v44 }
 0x358   : > { %v1431_v10 = vpop.f32.mrf.mxu1 }
 0x359   : > { %1523 = vst.msk [vmem:[%s2229_s20 + $0x78] sm:$0xff] %vm1507_vm2, %v1440_v9  ;;  %v1432_v11 = vadd.f32 %v2224_v44, %v1431_v10 }
 0x35a   : > { %v1893_v12 = vpop.f32.mrf.mxu1 }
 0x35b   : > { %1521 = vst.msk [vmem:[%s2229_s20 + $0x68] sm:$0xff] %vm1507_vm2, %v1432_v11  ;;  %v1453_v13 = vadd.f32 %v1893_v12, %v2224_v44 }
 0x35c   : > { %v1444_v14 = vpop.f32.mrf.mxu1 }
 0x35d   : > { %1526 = vst.msk [vmem:[%s2229_s20 + $0x90] sm:$0xff] %vm1507_vm2, %v1453_v13  ;;  %v1445_v15 = vadd.f32 %v2224_v44, %v1444_v14 }
 0x35e   : > { %v1894_v16 = vpop.f32.mrf.mxu1 }
 0x35f   : > { %1524 = vst.msk [vmem:[%s2229_s20 + $0x80] sm:$0xff] %vm1507_vm2, %v1445_v15  ;;  %v1456_v17 = vadd.f32 %v1894_v16, %v2224_v44 }
 0x360   : > { %v1447_v18 = vpop.f32.mrf.mxu1 }
 0x361   : > { %1527 = vst.msk [vmem:[%s2229_s20 + $0x98] sm:$0xff] %vm1507_vm2, %v1456_v17  ;;  %v1448_v19 = vadd.f32 %v2224_v44, %v1447_v18 }
 0x362   : > { %v1897_v20 = vpop.f32.mrf.mxu1 }
 0x363   : > { %1525 = vst.msk [vmem:[%s2229_s20 + $0x88] sm:$0xff] %vm1507_vm2, %v1448_v19  ;;  %v1469_v21 = vadd.f32 %v1897_v20, %v2224_v44 }
 0x364   : > { %v1460_v22 = vpop.f32.mrf.mxu1 }
 0x365   : > { %1530 = vst.msk [vmem:[%s2229_s20 + $0xb0] sm:$0xff] %vm1507_vm2, %v1469_v21  ;;  %v1461_v24 = vadd.f32 %v2224_v44, %v1460_v22 }
 0x366   : > { %v1898_v25 = vpop.f32.mrf.mxu1 }
 0x367   : > { %1528 = vst.msk [vmem:[%s2229_s20 + $0xa0] sm:$0xff] %vm1507_vm2, %v1461_v24  ;;  %v1472_v26 = vadd.f32 %v1898_v25, %v2224_v44 }
 0x368   : > { %v1463_v27 = vpop.f32.mrf.mxu1 }
 0x369   : > { %1531 = vst.msk [vmem:[%s2229_s20 + $0xb8] sm:$0xff] %vm1507_vm2, %v1472_v26  ;;  %v1464_v28 = vadd.f32 %v2224_v44, %v1463_v27 }
 0x36a   : > { %v1901_v29 = vpop.f32.mrf.mxu1 }
 0x36b   : > { %1529 = vst.msk [vmem:[%s2229_s20 + $0xa8] sm:$0xff] %vm1507_vm2, %v1464_v28  ;;  %v1485_v30 = vadd.f32 %v1901_v29, %v2224_v44 }
 0x36c   : > { %v1476_v31 = vpop.f32.mrf.mxu1 }
 0x36d   : > { %1534 = vst.msk [vmem:[%s2229_s20 + $0xd0] sm:$0xff] %vm1507_vm2, %v1485_v30  ;;  %v1477_v32 = vadd.f32 %v2224_v44, %v1476_v31 }
 0x36e   : > { %v1902_v33 = vpop.f32.mrf.mxu1 }
 0x36f   : > { %1532 = vst.msk [vmem:[%s2229_s20 + $0xc0] sm:$0xff] %vm1507_vm2, %v1477_v32  ;;  %v1488_v34 = vadd.f32 %v1902_v33, %v2224_v44 }
 0x370   : > { %v1479_v35 = vpop.f32.mrf.mxu1 }
 0x371   : > { %1535 = vst.msk [vmem:[%s2229_s20 + $0xd8] sm:$0xff] %vm1507_vm2, %v1488_v34  ;;  %v1480_v36 = vadd.f32 %v2224_v44, %v1479_v35 }
 0x372   : > { %v1905_v37 = vpop.f32.mrf.mxu1 }
 0x373   : > { %1533 = vst.msk [vmem:[%s2229_s20 + $0xc8] sm:$0xff] %vm1507_vm2, %v1480_v36  ;;  %v1501_v38 = vadd.f32 %v1905_v37, %v2224_v44 }
 0x374   : > { %v1492_v39 = vpop.f32.mrf.mxu1 }
 0x375   : > { %1538 = vst.msk [vmem:[%s2229_s20 + $0xf0] sm:$0xff] %vm1507_vm2, %v1501_v38  ;;  %v1493_v40 = vadd.f32 %v2224_v44, %v1492_v39 }
 0x376   : > { %v1906_v41 = vpop.f32.mrf.mxu1 }
 0x377   : > { %1536 = vst.msk [vmem:[%s2229_s20 + $0xe0] sm:$0xff] %vm1507_vm2, %v1493_v40  ;;  %v1504_v42 = vadd.f32 %v1906_v41, %v2224_v44 }
 0x378   : > { %v1495_v43 = vpop.f32.mrf.mxu1 }
 0x379   : > { %1539 = vst.msk [vmem:[%s2229_s20 + $0xf8] sm:$0xff] %vm1507_vm2, %v1504_v42  ;;  %v1496_v60 = vadd.f32 %v2224_v44, %v1495_v43 }
 0x37b   : > { %1537 = vst.msk [vmem:[%s2229_s20 + $0xe8] sm:$0xff] %vm1507_vm2, %v1496_v60 }
 0x37c PF: > { %s19_s30 = sadd.s32 1, %s1943_s30  }
 0x37d   : > { %p16_p4 = scmp.ge.s32.totalorder %s19_s30, 6  }
 0x37f   :  { %18 = sbr.rel (!%p16_p4) target bundleno = 1 (0x1), region = 86 }

</bundles_post_ra>
